<compile_context>
chip_gen: v6e
topology: v6e:2x2x1
jax: 0.10.0
libtpu: 0.0.40
codegen_flags: <defaults>
</compile_context>

<pallas_src>
import functools
import math

import jax
import jax.numpy as jnp
from jax.experimental import pallas as pl
from jax.experimental.pallas import tpu as pltpu


_MAX_FULL_K = 4096                       # K above this -> K-tiled accumulator kernel
_VMEM_TILE_BUDGET = 12 * 1024 * 1024     # stay well under v5e's 16 MiB scoped default


# ----------------------------------------------------------------------------
# tile-size helpers
# ----------------------------------------------------------------------------
def _pick_tile(dim, preferred):
    """Largest preferred tile that divides `dim`, else the full dim (keeps the
    (8,128) BlockSpec rule satisfied for small/odd shapes)."""
    for t in preferred:
        if t <= dim and dim % t == 0:
            return t
    return dim


def _pick_m_tile(m_dim, k_dim, tn, has_residual):
    """Largest row tile that divides m_dim and keeps the double-buffered block
    set (x f32, w bf16, out/residual f32) under the VMEM budget."""
    fallback = None
    for t in (512, 256, 128, 64, 32, 16, 8):
        if t > m_dim or m_dim % t:
            continue
        fallback = t
        est = 2 * (t * k_dim * 4 + k_dim * tn * 2
                   + t * tn * 4 * (2 if has_residual else 1))
        if est <= _VMEM_TILE_BUDGET:
            return t
    return fallback if fallback is not None else m_dim


# ----------------------------------------------------------------------------
# standalone LayerNorm kernel (fallback only; normally fused into the matmul)
# ----------------------------------------------------------------------------
def _layernorm_kernel(x_ref, g_ref, b_ref, o_ref, *, eps):
    x = x_ref[...].astype(jnp.float32)
    mean = jnp.mean(x, axis=-1, keepdims=True)
    xc = x - mean
    var = jnp.mean(xc * xc, axis=-1, keepdims=True)
    inv = jax.lax.rsqrt(var + jnp.float32(eps))
    y = xc * inv * g_ref[...].astype(jnp.float32) + b_ref[...].astype(jnp.float32)
    o_ref[...] = y.astype(o_ref.dtype)


def layer_norm(x, gamma, beta, *, eps=1e-5, tile_rows=1024):
    orig_shape = x.shape
    e = x.shape[-1]
    rows = x.size // e
    xf = x.reshape(rows, e)

    tr = min(tile_rows, rows)
    pad = (-rows) % tr
    if pad:
        xf = jnp.pad(xf, ((0, pad), (0, 0)))
    r_tot = xf.shape[0]

    out = pl.pallas_call(
        functools.partial(_layernorm_kernel, eps=eps),
        out_shape=jax.ShapeDtypeStruct((r_tot, e), x.dtype),
        grid=(r_tot // tr,),
        in_specs=[
            pl.BlockSpec((tr, e), lambda i: (i, 0)),
            pl.BlockSpec((1, e), lambda i: (0, 0)),
            pl.BlockSpec((1, e), lambda i: (0, 0)),
        ],
        out_specs=pl.BlockSpec((tr, e), lambda i: (i, 0)),
        compiler_params=pltpu.CompilerParams(dimension_semantics=("parallel",)),
    )(xf, gamma.reshape(1, e), beta.reshape(1, e))

    if pad:
        out = out[:rows]
    return out.reshape(orig_shape)


# ----------------------------------------------------------------------------
# Fused linear (full-K): out = [residual +] act( LN?(x) @ w_bf16 + b )
# ----------------------------------------------------------------------------
def _fused_linear_kernel(*refs, activation, fuse_ln, add_residual, eps):
    idx = 0
    x_ref = refs[idx]; idx += 1
    w_ref = refs[idx]; idx += 1
    b_ref = refs[idx]; idx += 1
    if fuse_ln:
        g_ref = refs[idx]; idx += 1
        lb_ref = refs[idx]; idx += 1
    if add_residual:
        r_ref = refs[idx]; idx += 1
    o_ref = refs[idx]

    x = x_ref[...].astype(jnp.float32)                      # (tm, K)
    if fuse_ln:                                             # LN in f32 on full K
        mean = jnp.mean(x, axis=-1, keepdims=True)
        xc = x - mean
        var = jnp.mean(xc * xc, axis=-1, keepdims=True)
        x = (xc * jax.lax.rsqrt(var + jnp.float32(eps))
             * g_ref[...].astype(jnp.float32) + lb_ref[...].astype(jnp.float32))

    # bf16 MXU matmul with f32 accumulation.
    y = jnp.dot(x.astype(w_ref.dtype), w_ref[...], preferred_element_type=jnp.float32)
    y = y + b_ref[...].astype(jnp.float32)
    if activation == "quick_gelu":
        y = y * jax.nn.sigmoid(jnp.float32(1.702) * y)
    if add_residual:
        y = y + r_ref[...].astype(jnp.float32)
    o_ref[...] = y.astype(o_ref.dtype)


# K-tiled fallback (only used when K > _MAX_FULL_K).
def _linear_ktiled_kernel(x_ref, w_ref, b_ref, *rest, activation, add_residual):
    if add_residual:
        r_ref, o_ref, acc_ref = rest
    else:
        o_ref, acc_ref = rest
        r_ref = None
    k = pl.program_id(2)

    @pl.when(k == 0)
    def _():
        acc_ref[...] = jnp.zeros_like(acc_ref)

    acc_ref[...] += jnp.dot(x_ref[...].astype(w_ref.dtype), w_ref[...],
                            preferred_element_type=jnp.float32)

    @pl.when(k == pl.num_programs(2) - 1)
    def _():
        y = acc_ref[...] + b_ref[...].astype(jnp.float32)
        if activation == "quick_gelu":
            y = y * jax.nn.sigmoid(jnp.float32(1.702) * y)
        if add_residual:
            y = y + r_ref[...].astype(jnp.float32)
        o_ref[...] = y.astype(o_ref.dtype)


def fused_linear(x, w, b, *, residual=None, ln=None, activation=None, eps=1e-5):
    """x: (..., K), w: (K, N) bf16, b: (N,).  Optional fused LN (gamma, beta),
    QuickGELU activation and residual add, all in the matmul epilogue/prologue."""
    *lead, k_dim = x.shape
    k_w, n_dim = w.shape
    assert k_dim == k_w
    m_dim = 1
    for s in lead:
        m_dim *= s

    if ln is not None and k_dim > _MAX_FULL_K:
        # TODO(synk): LN fusion for very large K; fall back to standalone LN.
        x = layer_norm(x, ln[0], ln[1], eps=eps)
        ln = None

    xf = x.reshape(m_dim, k_dim)
    rf = residual.reshape(m_dim, n_dim) if residual is not None else None
    bm = b.reshape(1, n_dim)

    tn = _pick_tile(n_dim, (512, 256, 128))
    add_residual = residual is not None
    fuse_ln = ln is not None

    if k_dim <= _MAX_FULL_K:
        tm = _pick_m_tile(m_dim, k_dim, tn, add_residual)
        grid = (m_dim // tm, n_dim // tn)

        in_specs = [
            pl.BlockSpec((tm, k_dim), lambda i, j: (i, 0)),
            pl.BlockSpec((k_dim, tn), lambda i, j: (0, j)),
            pl.BlockSpec((1, tn), lambda i, j: (0, j)),
        ]
        args = [xf, w, bm]
        if fuse_ln:
            in_specs += [pl.BlockSpec((1, k_dim), lambda i, j: (0, 0)),
                         pl.BlockSpec((1, k_dim), lambda i, j: (0, 0))]
            args += [ln[0].reshape(1, k_dim), ln[1].reshape(1, k_dim)]
        if add_residual:
            in_specs.append(pl.BlockSpec((tm, tn), lambda i, j: (i, j)))
            args.append(rf)

        out = pl.pallas_call(
            functools.partial(_fused_linear_kernel, activation=activation,
                              fuse_ln=fuse_ln, add_residual=add_residual, eps=eps),
            out_shape=jax.ShapeDtypeStruct((m_dim, n_dim), x.dtype),
            grid=grid,
            in_specs=in_specs,
            out_specs=pl.BlockSpec((tm, tn), lambda i, j: (i, j)),
            compiler_params=pltpu.CompilerParams(
                dimension_semantics=("parallel", "parallel")),
        )(*args)
    else:
        tk = _pick_tile(k_dim, (512, 256, 128))
        tm = _pick_m_tile(m_dim, tk, tn, add_residual)
        grid = (m_dim // tm, n_dim // tn, k_dim // tk)

        in_specs = [
            pl.BlockSpec((tm, tk), lambda i, j, k: (i, k)),
            pl.BlockSpec((tk, tn), lambda i, j, k: (k, j)),
            pl.BlockSpec((1, tn), lambda i, j, k: (0, j)),
        ]
        args = [xf, w, bm]
        if add_residual:
            in_specs.append(pl.BlockSpec((tm, tn), lambda i, j, k: (i, j)))
            args.append(rf)

        out = pl.pallas_call(
            functools.partial(_linear_ktiled_kernel, activation=activation,
                              add_residual=add_residual),
            out_shape=jax.ShapeDtypeStruct((m_dim, n_dim), x.dtype),
            grid=grid,
            in_specs=in_specs,
            out_specs=pl.BlockSpec((tm, tn), lambda i, j, k: (i, j)),
            scratch_shapes=[pltpu.VMEM((tm, tn), jnp.float32)],
            compiler_params=pltpu.CompilerParams(
                dimension_semantics=("parallel", "parallel", "arbitrary")),
        )(*args)

    return out.reshape(*lead, n_dim)


# ----------------------------------------------------------------------------
# Attention: one batch per grid step, all heads per step, fp32 softmax.
# Input is the raw (N, L, 3E) QKV projection; heads are sliced in-kernel
# (no out-of-kernel split/transpose round trips).
# ----------------------------------------------------------------------------
def _attention_kernel(qkv_ref, o_ref, *, num_heads, scale):
    qkv = qkv_ref[0]                                        # (L, 3E)
    e = qkv.shape[-1] // 3
    hd = e // num_heads
    for h in range(num_heads):                              # static unroll over heads
        q = qkv[:, h * hd:(h + 1) * hd].astype(jnp.float32) * jnp.float32(scale)
        k = qkv[:, e + h * hd:e + (h + 1) * hd]
        v = qkv[:, 2 * e + h * hd:2 * e + (h + 1) * hd]
        # q @ k^T on the bf16 MXU path, f32 accumulation, no materialized transpose.
        s = jax.lax.dot_general(q.astype(jnp.bfloat16), k.astype(jnp.bfloat16),
                                (((1,), (1,)), ((), ())),
                                preferred_element_type=jnp.float32)      # (L, L)
        s = s - jnp.max(s, axis=-1, keepdims=True)
        p = jnp.exp(s)
        p = p * pl.reciprocal(jnp.sum(p, axis=-1, keepdims=True), approx=True)
        o = jnp.dot(p.astype(jnp.bfloat16), v.astype(jnp.bfloat16),
                    preferred_element_type=jnp.float32)                  # (L, hd)
        # TODO(synk): pack per-head results into one lane-dense (L, E) store.
        o_ref[0, :, h * hd:(h + 1) * hd] = o.astype(o_ref.dtype)


def attention(qkv, num_heads):
    """qkv: (N, L, 3E) -> (N, L, E)."""
    n, l, three_e = qkv.shape
    e = three_e // 3
    hd = e // num_heads
    scale = 1.0 / math.sqrt(hd)
    # TODO(synk): KV-tiled flash variant for long sequences (seq >= ~2048).
    return pl.pallas_call(
        functools.partial(_attention_kernel, num_heads=num_heads, scale=scale),
        out_shape=jax.ShapeDtypeStruct((n, l, e), qkv.dtype),
        grid=(n,),
        in_specs=[pl.BlockSpec((1, l, three_e), lambda i: (i, 0, 0))],
        out_specs=pl.BlockSpec((1, l, e), lambda i: (i, 0, 0)),
        compiler_params=pltpu.CompilerParams(dimension_semantics=("parallel",)),
    )(qkv)


# ----------------------------------------------------------------------------
# Residual attention block (batch-first internal layout: (N, L, E))
# ----------------------------------------------------------------------------
def residual_attention_block(x_nle, p, num_heads):
    qkv = fused_linear(x_nle, p["in_w"], p["in_b"],
                       ln=(p["ln1_g"], p["ln1_b"]))                    # LN1 + QKV proj
    a = attention(qkv, num_heads)                                      # (N, L, E)
    x = fused_linear(a, p["out_w"], p["out_b"], residual=x_nle)        # out_proj + res
    h = fused_linear(x, p["fc_w"], p["fc_b"],
                     ln=(p["ln2_g"], p["ln2_b"]),
                     activation="quick_gelu")                          # LN2 + c_fc + gelu
    x = fused_linear(h, p["proj_w"], p["proj_b"], residual=x)          # c_proj + res
    return x


class TransformerV2:
    """JAX/Pallas mirror of Transformer_v2.forward (returns per-layer embeddings).

    Weights are stored in bf16 (MXU-native); LN params / biases / activations
    stay f32.  Input/output layout matches the torch module: (seq, batch, width).
    """

    def __init__(self, width, layers, heads, attn_mask=None, drop_path_rate=0.0,
                 *, key, dtype=jnp.float32, weight_dtype=jnp.bfloat16):
        if attn_mask is not None:
            # TODO(synk): additive attn_mask support (reference default is None).
            raise NotImplementedError("attn_mask is not supported")
        self.width, self.layers, self.heads = width, layers, heads
        self.drop_path_rate = drop_path_rate  # unused by the reference forward
        self.params = []
        for lk in jax.random.split(key, layers):
            ks = jax.random.split(lk, 8)
            w = width
            self.params.append(dict(
                ln1_g=(1.0 + 0.1 * jax.random.normal(ks[0], (w,), dtype)),
                ln1_b=(0.1 * jax.random.normal(ks[1], (w,), dtype)),
                ln2_g=jnp.ones((w,), dtype),
                ln2_b=jnp.zeros((w,), dtype),
                in_w=(0.05 * jax.random.normal(ks[2], (w, 3 * w), jnp.float32)
                      ).astype(weight_dtype),
                in_b=(0.02 * jax.random.normal(ks[3], (3 * w,), dtype)),
                out_w=(0.05 * jax.random.normal(ks[4], (w, w), jnp.float32)
                       ).astype(weight_dtype),
                out_b=jnp.zeros((w,), dtype),
                fc_w=(0.05 * jax.random.normal(ks[5], (w, 4 * w), jnp.float32)
                      ).astype(weight_dtype),
                fc_b=(0.02 * jax.random.normal(ks[6], (4 * w,), dtype)),
                proj_w=(0.05 * jax.random.normal(ks[7], (4 * w, w), jnp.float32)
                        ).astype(weight_dtype),
                proj_b=jnp.zeros((w,), dtype),
            ))

    def __call__(self, x):
        # x: (L, N, E) seq-first; run batch-first internally (one transpose in,
        # one per returned layer) so attention blocks are contiguous per batch.
        x_nle = jnp.transpose(x, (1, 0, 2))
        t_embeddings = []
        for p in self.params:
            x_nle = residual_attention_block(x_nle, p, self.heads)
            t_embeddings.append(jnp.transpose(x_nle, (1, 0, 2)))
        return t_embeddings


# ----------------------------------------------------------------------------
# pure-JAX reference (mirrors the kernels' bf16-matmul / f32-accumulate numerics)
# ----------------------------------------------------------------------------
def _reference_forward(x, params, num_heads):
    def ln(t, g, b, eps=1e-5):
        tf = t.astype(jnp.float32)
        m = tf.mean(-1, keepdims=True)
        v = ((tf - m) ** 2).mean(-1, keepdims=True)
        return (tf - m) * jax.lax.rsqrt(v + eps) * g + b

    def mm(a, w, b):
        return jnp.dot(a.astype(jnp.bfloat16), w.astype(jnp.bfloat16),
                       preferred_element_type=jnp.float32) + b.astype(jnp.float32)

    outs = []
    for p in params:
        seq, bsz, e = x.shape
        hd = e // num_heads
        scale = 1.0 / math.sqrt(hd)
        h = ln(x, p["ln1_g"], p["ln1_b"])
        qkv = mm(h, p["in_w"], p["in_b"])
        q, k, v = jnp.split(qkv, 3, axis=-1)

        def heads(t):
            return t.reshape(seq, bsz, num_heads, hd).transpose(1, 2, 0, 3)

        qh, kh, vh = heads(q), heads(k), heads(v)
        s = jnp.einsum("nhld,nhmd->nhlm",
                       (qh * scale).astype(jnp.bfloat16), kh.astype(jnp.bfloat16),
                       preferred_element_type=jnp.float32)
        a = jax.nn.softmax(s, axis=-1)
        o = jnp.einsum("nhlm,nhmd->nhld",
                       a.astype(jnp.bfloat16), vh.astype(jnp.bfloat16),
                       preferred_element_type=jnp.float32)
        o = o.transpose(2, 0, 1, 3).reshape(seq, bsz, e)
        x = x + mm(o, p["out_w"], p["out_b"])
        h2 = ln(x, p["ln2_g"], p["ln2_b"])
        u = mm(h2, p["fc_w"], p["fc_b"])
        u = u * jax.nn.sigmoid(1.702 * u)
        x = x + mm(u, p["proj_w"], p["proj_b"])
        outs.append(x)
    return outs


# ----------------------------------------------------------------------------
if __name__ == "__main__":
    key = jax.random.PRNGKey(0)
    k_x, k_params = jax.random.split(key)

    # small shapes consistent with the module: (seq, batch, width), heads | width
    SEQ, BATCH, WIDTH, HEADS, LAYERS = 8, 2, 32, 4, 2
    x = jax.random.normal(k_x, (SEQ, BATCH, WIDTH), dtype=jnp.float32)

    model = TransformerV2(width=WIDTH, layers=LAYERS, heads=HEADS, key=k_params)
    t_embeddings = jax.block_until_ready(model(x))

    assert len(t_embeddings) == LAYERS
    ref = _reference_forward(x, model.params, HEADS)
    for got, want in zip(t_embeddings, ref):
        assert got.shape == (SEQ, BATCH, WIDTH)
        assert bool(jnp.all(jnp.isfinite(got)))
        assert bool(jnp.allclose(got, want, atol=1e-2, rtol=1e-2)), \
            "mismatch vs jnp reference"

    print("KERNEL_OK")
</pallas_src>

<mosaic_0001>
module attributes {stable_mosaic.version = 11 : i64} {
  func.func @_fused_linear_kernel(%arg0: i32, %arg1: i32, %arg2: memref<16x32xf32, #tpu.memory_space<vmem>>, %arg3: memref<32x96xbf16, #tpu.memory_space<vmem>>, %arg4: memref<1x96xf32, #tpu.memory_space<vmem>>, %arg5: memref<1x32xf32, #tpu.memory_space<vmem>>, %arg6: memref<1x32xf32, #tpu.memory_space<vmem>>, %arg7: memref<16x96xf32, #tpu.memory_space<vmem>>) attributes {dimension_semantics = [#tpu.dimension_semantics<parallel>, #tpu.dimension_semantics<parallel>], iteration_bounds = array<i64: 1, 1>, scalar_prefetch = 0 : i64, scratch_operands = 0 : i64, tpu.core_type = #tpu.core_type<tc>, window_params = [{transform_indices = @transform_0, window_bounds = array<i64: 16, 32>}, {transform_indices = @transform_1, window_bounds = array<i64: 32, 96>}, {transform_indices = @transform_2, window_bounds = array<i64: 1, 96>}, {pipeline_mode = #tpu.pipeline_mode<synchronous>, transform_indices = @transform_3, window_bounds = array<i64: 1, 32>}, {pipeline_mode = #tpu.pipeline_mode<synchronous>, transform_indices = @transform_4, window_bounds = array<i64: 1, 32>}, {transform_indices = @transform_5, window_bounds = array<i64: 16, 96>}]} {
    %c0 = arith.constant 0 : index
    %c0_0 = arith.constant 0 : index
    %0 = vector.load %arg2[%c0, %c0_0] : memref<16x32xf32, #tpu.memory_space<vmem>>, vector<16x32xf32>
    %cst = arith.constant dense<0.000000e+00> : vector<16xf32>
    %1 = vector.multi_reduction <add>, %0, %cst [1] : vector<16x32xf32> to vector<16xf32>
    %2 = vector.shape_cast %1 : vector<16xf32> to vector<16x1xf32>
    %cst_1 = arith.constant 3.200000e+01 : f32
    %3 = vector.broadcast %cst_1 : f32 to vector<16x1xf32>
    %4 = arith.divf %2, %3 : vector<16x1xf32>
    %5 = vector.broadcast %4 : vector<16x1xf32> to vector<16x32xf32>
    %6 = arith.subf %0, %5 : vector<16x32xf32>
    %7 = arith.mulf %6, %6 : vector<16x32xf32>
    %cst_2 = arith.constant dense<0.000000e+00> : vector<16xf32>
    %8 = vector.multi_reduction <add>, %7, %cst_2 [1] : vector<16x32xf32> to vector<16xf32>
    %9 = vector.shape_cast %8 : vector<16xf32> to vector<16x1xf32>
    %cst_3 = arith.constant 3.200000e+01 : f32
    %10 = vector.broadcast %cst_3 : f32 to vector<16x1xf32>
    %11 = arith.divf %9, %10 : vector<16x1xf32>
    %cst_4 = arith.constant 9.99999974E-6 : f32
    %12 = vector.broadcast %cst_4 : f32 to vector<16x1xf32>
    %13 = arith.addf %11, %12 : vector<16x1xf32>
    %14 = math.rsqrt %13 : vector<16x1xf32>
    %15 = vector.broadcast %14 : vector<16x1xf32> to vector<16x32xf32>
    %16 = arith.mulf %6, %15 : vector<16x32xf32>
    %c0_5 = arith.constant 0 : index
    %c0_6 = arith.constant 0 : index
    %17 = vector.load %arg5[%c0_5, %c0_6] : memref<1x32xf32, #tpu.memory_space<vmem>>, vector<1x32xf32>
    %18 = vector.broadcast %17 : vector<1x32xf32> to vector<16x32xf32>
    %19 = arith.mulf %16, %18 : vector<16x32xf32>
    %c0_7 = arith.constant 0 : index
    %c0_8 = arith.constant 0 : index
    %20 = vector.load %arg6[%c0_7, %c0_8] : memref<1x32xf32, #tpu.memory_space<vmem>>, vector<1x32xf32>
    %21 = vector.broadcast %20 : vector<1x32xf32> to vector<16x32xf32>
    %22 = arith.addf %19, %21 : vector<16x32xf32>
    %23 = arith.truncf %22 : vector<16x32xf32> to vector<16x32xbf16>
    %c0_9 = arith.constant 0 : index
    %c0_10 = arith.constant 0 : index
    %24 = vector.load %arg3[%c0_9, %c0_10] : memref<32x96xbf16, #tpu.memory_space<vmem>>, vector<32x96xbf16>
    %cst_11 = arith.constant dense<0.000000e+00> : vector<16x96xf32>
    %25 = tpu.matmul %23, %24, %cst_11 {dimension_numbers = #tpu.dot_dimension_numbers<[1], [0], [0], [1], [0, 0, 1, 1], [], []>} : vector<16x32xbf16>, vector<32x96xbf16>, vector<16x96xf32> -> vector<16x96xf32>
    %c0_12 = arith.constant 0 : index
    %c0_13 = arith.constant 0 : index
    %26 = vector.load %arg4[%c0_12, %c0_13] : memref<1x96xf32, #tpu.memory_space<vmem>>, vector<1x96xf32>
    %27 = vector.broadcast %26 : vector<1x96xf32> to vector<16x96xf32>
    %28 = arith.addf %25, %27 : vector<16x96xf32>
    %c0_14 = arith.constant 0 : index
    %c0_15 = arith.constant 0 : index
    %29 = vector.load %arg7[%c0_14, %c0_15] : memref<16x96xf32, #tpu.memory_space<vmem>>, vector<16x96xf32>
    tpu.vector_store %arg7[%c0_14, %c0_15], %28 {strides = array<i32>} : memref<16x96xf32, #tpu.memory_space<vmem>>, vector<16x96xf32>,
    return
  }
  func.func @transform_0(%arg0: i32, %arg1: i32) -> (i32, i32) {
    %c0_i32 = arith.constant 0 : i32
    %c0_i32_0 = arith.constant 0 : i32
    return %arg0, %c0_i32 : i32, i32
  }
  func.func @transform_1(%arg0: i32, %arg1: i32) -> (i32, i32) {
    %c0_i32 = arith.constant 0 : i32
    %c0_i32_0 = arith.constant 0 : i32
    return %c0_i32, %arg1 : i32, i32
  }
  func.func @transform_2(%arg0: i32, %arg1: i32) -> (i32, i32) {
    %c0_i32 = arith.constant 0 : i32
    %c0_i32_0 = arith.constant 0 : i32
    return %c0_i32, %arg1 : i32, i32
  }
  func.func @transform_3(%arg0: i32, %arg1: i32) -> (i32, i32) {
    %c0_i32 = arith.constant 0 : i32
    %c0_i32_0 = arith.constant 0 : i32
    %c0_i32_1 = arith.constant 0 : i32
    return %c0_i32, %c0_i32_0 : i32, i32
  }
  func.func @transform_4(%arg0: i32, %arg1: i32) -> (i32, i32) {
    %c0_i32 = arith.constant 0 : i32
    %c0_i32_0 = arith.constant 0 : i32
    %c0_i32_1 = arith.constant 0 : i32
    return %c0_i32, %c0_i32_0 : i32, i32
  }
  func.func @transform_5(%arg0: i32, %arg1: i32) -> (i32, i32) {
    %c0_i32 = arith.constant 0 : i32
    return %arg0, %arg1 : i32, i32
  }
}

</mosaic_0001>

<bundles_post_ra>
// kernel: tpu_custom_call.1
= control target key start
LH: loop header
LB: loop body
LE: loop exit
PB: predicated region body
PF: predicated region fallthrough
CT: control target
= control target key end

     0   :  { %10 = vsyncpa [#allocation3], 0  ;;  %s353_s0 = inlined_call_operand.hbm [shape: f32[16,32], index: 0, kind: input, shape index: {}]   ;;  %s354_s1 = inlined_call_operand.hbm [shape: bf16[32,96], index: 1, kind: input, shape index: {}]   ;;  %s355_s2 = inlined_call_operand.vmem [shape: f32[1,96], index: 2, kind: input, shape index: {}]   ;;  %s356_s3 = inlined_call_operand.vmem [shape: f32[1,32], index: 3, kind: input, shape index: {}]   ;;  %s357_s4 = inlined_call_operand.vmem [shape: f32[1,32], index: 4, kind: input, shape index: {}]   ;;  %s358_s5 = inlined_call_operand.hbm [shape: f32[16,96], index: 5, kind: output, shape index: {}]  }
   0x1   :  { %11 = vsyncpa [#allocation6], 0 }
   0x2   :  { %12 = vsyncpa [#allocation4], 0  ;;  %s285_s18 = smov [#allocation2]  }
   0x3   :  { %s18_s19 = sshll.u32 %s285_s18, 4  ;;  %s19_s19 = int_to_ptr.vmem [resolvable:$true] %s18_s19 }
   0x4   :  { %s227_s20 = scalar_lea.vmem %s19_s19, 256  ;;  %p232_p1 = scmp.lt.s32.totalorder %s19_s19, %s19_s19 }
   0x5   :  { %p228_p0 = scmp.ne.s32.totalorder %s19_s19, %s227_s20  ;;  %p233_p2 = scmp.lt.s32.totalorder %s227_s20, %s227_s20 }
   0x7   :  { %p234_p3 = por %p233_p2, %p232_p1 }
   0x9   :  { %p235_p4 = pnand %p234_p3, %p228_p0 }
   0xb   :  { %238 = shalt.err (!%p235_p4)
}
   0xc   :  { %s286_s21 = smov 128   ;;  %s287_s22 = smov 8  }
   0xd   :  { %24 = dma.hbm_to_vmem [thread:$0]  %s353_s0, 256, %s19_s19, [#allocation3], %s286_s21, %s286_s21, %s287_s22  }
   0xe   :  { %s288_s25 = smov [#allocation5]  }
   0xf   :  { %s30_s26 = sshll.u32 %s288_s25, 4  ;;  %s31_s26 = int_to_ptr.vmem [resolvable:$true] %s30_s26 }
  0x10   :  { %s247_s27 = scalar_lea.vmem %s31_s26, 256  ;;  %p252_p6 = scmp.lt.s32.totalorder %s31_s26, %s31_s26 }
  0x11   :  { %p248_p5 = scmp.ne.s32.totalorder %s31_s26, %s247_s27  ;;  %p253_p7 = scmp.lt.s32.totalorder %s247_s27, %s247_s27 }
  0x13   :  { %p254_p8 = por %p253_p7, %p252_p6 }
  0x15   :  { %p255_p9 = pnand %p254_p8, %p248_p5 }
  0x17   :  { %258 = shalt.err (!%p255_p9)
}
  0x18   :  { %s289_s28 = smov 64   ;;  %s290_s29 = smov 4  }
  0x19   :  { %36 = dma.hbm_to_vmem [thread:$0]  %s354_s1, 256, %s31_s26, [#allocation6], %s289_s28, %s289_s28, %s290_s29  }
  0x1a   :  { %279 = dma.done.wait [#allocation3], 256  }
  0x1b   :  { %280 = vsyncadd [#allocation3], 4294967040 }
  0x1c   :  { %281 = dma.done.wait [#allocation6], 256  }
  0x1d   :  { %282 = vsyncadd [#allocation6], 4294967040  ;;  %vm52_vm0 = vcmask 261120   ;;  %v50_v0 = vld [vmem:[#allocation2] sm:$0xff]  ;;  %v51_v1 = vld [vmem:[#allocation2 + $0x8] sm:$0xff]  ;;  %v291_v15 = vmov 0.0  }
  0x1e   :  { %v53_v2 = vsel %vm52_vm0, %v50_v0, 0.0  ;;  %v56_v3 = vsel %vm52_vm0, %v51_v1, 0.0  ;;  %v213_v14 = vld [vmem:[#allocation5 + $0x8] sm:$0xff]   ;;  %196 = vmatprep.subr.bf16.mxu0 %v291_v15  ;;  %vm292_vm1 = vmmov 0   ;;  %v214_v16 = vld [vmem:[#allocation5] sm:$0xff]   ;;  %vm166_vm2 = vcmask 785408  }
  0x1f   :  { %54 = vadd.xlane.f32.xlu0 %v53_v2  ;;  %200 = vmatprep.mubr.msk.bf16.mxu0 %vm292_vm1, %v291_v15  ;;  %v187_v25 = vld [vmem:[%s356_s3] ss:$0 sm:$0xff]  ;;  %s293_s3 = smov [#allocation7]  }
  0x20   :  { %197 = vmatpush3.bf16.msra.mxu0 %v213_v14  ;;  %v188_v29 = vld [vmem:[%s357_s4] ss:$0 sm:$0xff]  ;;  %s174_s11 = sshll.u32 %s293_s3, 4  ;;  %s175_s11 = int_to_ptr.vmem [resolvable:$true] %s174_s11 }
  0x21   :  { %198 = vmatprep.subr.bf16.mxu0 %v291_v15  ;;  %v189_v34 = vld [vmem:[%s355_s2] ss:$0 sm:$0xff]  ;;  %s259_s4 = scalar_lea.vmem %s175_s11, 256  ;;  %p264_p11 = scmp.lt.s32.totalorder %s175_s11, %s175_s11 }
  0x22   :  { %p260_p10 = scmp.ne.s32.totalorder %s175_s11, %s259_s4  ;;  %p265_p12 = scmp.lt.s32.totalorder %s259_s4, %s259_s4 }
  0x23   :  { %57 = vadd.xlane.f32.xlu0 %v56_v3 }
  0x24   :  { %199 = vmatpush3.bf16.msra.mxu0 %v214_v16  ;;  %p266_p13 = por %p265_p12, %p264_p11 }
  0x26   :  { %p267_p0 = pnand %p266_p13, %p260_p10 }
  0xa8   :  { %v55_v4 = vpop.xlane.xlu0 %54 }
  0xa9   :  { %v60_v5 = vmul.f32 0.03125, %v55_v4 }
  0xab   :  { %v62_v6 = vsub.f32 %v50_v0, %v60_v5 }
  0xac   :  { %v58_v7 = vpop.xlane.xlu0 %57 }
  0xad   :  { %v61_v8 = vmul.f32 0.03125, %v58_v7  ;;  %v64_v9 = vmul.f32 %v62_v6, %v62_v6 }
  0xaf   :  { %v63_v10 = vsub.f32 %v51_v1, %v61_v8  ;;  %v66_v11 = vsel %vm52_vm0, %v64_v9, 0.0 }
  0xb0   :  { %67 = vadd.xlane.f32.xlu1 %v66_v11 }
  0xb1   :  { %v65_v12 = vmul.f32 %v63_v10, %v63_v10 }
  0xb3   :  { %v69_v13 = vsel %vm52_vm0, %v65_v12, 0.0 }
  0xb4   :  { %70 = vadd.xlane.f32.xlu1 %v69_v13 }
 0x139   :  { %v68_v17 = vpop.xlane.xlu1 %67 }
 0x13a   :  { %v72_v18 = vmul.f32 0.03125, %v68_v17 }
 0x13c   :  { %v74_v19 = vadd.f32 1e-05, %v72_v18 }
 0x13d   :  { %v71_v20 = vpop.xlane.xlu1 %70 }
 0x13e   :  { %215 = vrsqrt.f32 %v74_v19  ;;  %v73_v21 = vmul.f32 0.03125, %v71_v20 }
 0x140   :  { %v75_v22 = vadd.f32 1e-05, %v73_v21 }
 0x142   :  { %217 = vrsqrt.f32 %v75_v22 }
 0x14b   :  { %v216_v23 = vpop.eup %215 }
 0x14c   :  { %v78_v24 = vmul.f32 %v216_v23, %v62_v6 }
 0x14e   :  { %v87_v28 = vmul.f32 %v187_v25, %v78_v24 }
 0x14f   :  { %v218_v26 = vpop.eup %217 }
 0x150   :  { %v79_v27 = vmul.f32 %v218_v26, %v63_v10  ;;  %v96_v31 = vadd.f32 %v188_v29, %v87_v28 }
 0x152   :  { %v88_v30 = vmul.f32 %v187_v25, %v79_v27 }
 0x154   :  { %v97_v32 = vadd.f32 %v188_v29, %v88_v30 }
 0x156   :  { %v98_v33 = vpack.c.bf16 %v97_v32, %v96_v31 }
 0x158   :  { %201 = vmatmul.mubr.msk.bf16.vlgmr.msra.gmra.mxu0 %vm52_vm0, %v98_v33 }
 0x218   :  { %v159_v35 = vpop.f32.mrf.mxu0 }
 0x219   :  { %v160_v36 = vadd.f32 %v189_v34, %v159_v35 }
 0x21a   :  { %v202_v37 = vpop.f32.mrf.mxu0 }
 0x21b   :  { %167 = vst.msk [vmem:[#allocation7] sm:$0xff] %vm166_vm2, %v160_v36 }
 0x21c   :  { %v162_v38 = vpop.f32.mrf.mxu0 }
 0x21d   :  { %v163_v39 = vadd.f32 %v189_v34, %v162_v38 }
 0x21e   :  { %v203_v40 = vpop.f32.mrf.mxu0 }
 0x21f   :  { %168 = vst.msk [vmem:[#allocation7 + $0x8] sm:$0xff] %vm166_vm2, %v163_v39 }
 0x220   :  { %270 = shalt.err (!%p267_p0)
}
 0x221   :  { %180 = dma.vmem_to_hbm [thread:$0]  %s175_s11, 256, %s358_s5, [#allocation4], %s286_s21, %s286_s21, %s287_s22  }
 0x222   :  { %283 = dma.done.wait [#allocation4], 256  }
 0x223   :  { %284 = vsyncadd [#allocation4], 4294967040 }
 0x224   :  { %184 = vsyncpa [#allocation3], 1 }
 0x225   :  { %185 = vsyncpa [#allocation6], 1 }
 0x226   :  { %186 = vsyncpa [#allocation4], 1 }

</bundles_post_ra>
